<compile_context>
chip_gen: v6e
topology: v6e:2x2x1
jax: 0.10.0
libtpu: 0.0.40
codegen_flags: <defaults>
</compile_context>

<pallas_src>
import jax
import jax.numpy as jnp
from jax.experimental import pallas as pl
from jax.experimental.pallas import tpu as pltpu

_NEG_BIG = -1e30  # finite sentinel (avoids inf - inf = nan in the online update)


def _gated_kernel(v_ref, batch_ref, w_ref, bias_ref, out_ref, m_sc, l_sc, acc_sc):
    """One grid step over a tile of nodes.

    v_ref:     (TN, D)  node-feature tile
    batch_ref: (1, TN)  int32 graph id per node (lane-dense)
    w_ref:     (1, D)   Linear weight row (resident)
    bias_ref:  (1, 1)   Linear bias (resident)
    out_ref:   (B, D)   per-graph output (resident across the reduction axis)
    m_sc/l_sc: (B, 1)   running per-graph max / softmax denominator (f32 scratch)
    acc_sc:    (B, D)   unnormalized accumulator (f32 scratch)
    """
    step = pl.program_id(0)

    @pl.when(step == 0)
    def _init():
        m_sc[...] = jnp.full_like(m_sc, _NEG_BIG)
        l_sc[...] = jnp.zeros_like(l_sc)
        acc_sc[...] = jnp.zeros_like(acc_sc)

    V = v_ref[...]                    # (TN, D)
    batch = batch_ref[...]            # (1, TN) int32
    w = w_ref[...]                    # (1, D)
    B = acc_sc.shape[0]
    TN = V.shape[0]

    # scores on the MXU: (1, D) x (TN, D)^T -> (1, TN); lane-dense row layout.
    # (Bias is a per-node constant shift -> cancels under the segment softmax,
    #  but kept for exact fidelity with the PyTorch Linear.)
    s = jax.lax.dot_general(
        w, V,
        dimension_numbers=(((1,), (1,)), ((), ())),
        preferred_element_type=jnp.float32,
    ) + bias_ref[...]                 # (1, TN)

    # (B, TN) segment membership: onehot[g, i] = (batch[i] == g).
    g_iota = jax.lax.broadcasted_iota(jnp.int32, (B, TN), 0)
    onehot = batch == g_iota                                # (B, TN) bool

    masked = jnp.where(onehot, s, _NEG_BIG)                 # (B, TN)
    tile_max = jnp.max(masked, axis=1, keepdims=True)       # (B, 1)  lane reduce (XLU)
    m_new = jnp.maximum(m_sc[...], tile_max)                # (B, 1)
    a = jnp.exp(m_sc[...] - m_new)                          # rescale factor for old state
    p = jnp.where(onehot, jnp.exp(masked - m_new), 0.0)     # (B, TN) unnormalized weights

    l_sc[...] = a * l_sc[...] + jnp.sum(p, axis=1, keepdims=True)
    # Unnormalized segment sum on the MXU (standard contraction, no transpose).
    acc_sc[...] = a * acc_sc[...] + jax.lax.dot_general(
        p.astype(V.dtype), V,
        dimension_numbers=(((1,), (0,)), ((), ())),
        preferred_element_type=jnp.float32,
    )
    m_sc[...] = m_new

    @pl.when(step == pl.num_programs(0) - 1)
    def _finalize():
        # alpha is never materialized: scale the (B, D) accumulator exactly once.
        # approx=False keeps full precision for the tight correctness tolerance;
        # flip to approx=True to push the divide onto the otherwise-idle EUP slot.
        inv_l = pl.reciprocal(jnp.maximum(l_sc[...], 1e-30), approx=False)
        out_ref[...] = (acc_sc[...] * inv_l).astype(out_ref.dtype)


def _round_up(x, m):
    return (x + m - 1) // m * m


def gated_aggregation(V, batch_node_index, a_weight, a_bias, num_graphs, *, tile_n=512):
    """V: (N, D), batch_node_index: (N,) int, a_weight: (1, D), a_bias: (1,)."""
    N, D = V.shape
    B = int(num_graphs)
    B_pad = _round_up(max(B, 1), 8)              # sublane-aligned accumulator/output

    if N <= tile_n:
        TN = _round_up(max(N, 8), 8)             # single tile == full (padded) array
    else:
        TN = _round_up(tile_n, 128)              # lane-aligned (1, TN) index blocks
    N_pad = _round_up(N, TN)
    grid = (N_pad // TN,)

    V_p = V if N_pad == N else jnp.pad(V, ((0, N_pad - N), (0, 0)))
    batch = batch_node_index.astype(jnp.int32).reshape(N)
    # Pad with an id that matches no graph row, so padded nodes contribute nothing.
    batch_p = batch if N_pad == N else jnp.pad(batch, (0, N_pad - N),
                                               constant_values=B_pad)
    batch2d = batch_p.reshape(1, N_pad)          # lane-dense index row

    w2d = a_weight.reshape(1, D).astype(V.dtype)
    b2d = a_bias.reshape(1, 1).astype(jnp.float32)

    out = pl.pallas_call(
        _gated_kernel,
        out_shape=jax.ShapeDtypeStruct((B_pad, D), V.dtype),
        grid_spec=pltpu.PrefetchScalarGridSpec(
            num_scalar_prefetch=0,
            grid=grid,
            in_specs=[
                pl.BlockSpec((TN, D), lambda i: (i, 0)),    # V tiles stream over N
                pl.BlockSpec((1, TN), lambda i: (0, i)),    # lane-dense batch ids
                pl.BlockSpec((1, D), lambda i: (0, 0)),     # weight row (resident)
                pl.BlockSpec((1, 1), lambda i: (0, 0)),     # bias (resident)
            ],
            out_specs=pl.BlockSpec((B_pad, D), lambda i: (0, 0)),  # resident output
            scratch_shapes=[
                pltpu.VMEM((B_pad, 1), jnp.float32),        # running per-graph max
                pltpu.VMEM((B_pad, 1), jnp.float32),        # running denominator
                pltpu.VMEM((B_pad, D), jnp.float32),        # unnormalized accumulator
            ],
        ),
        compiler_params=pltpu.CompilerParams(
            dimension_semantics=("arbitrary",),             # N is a reduction axis
            vmem_limit_bytes=48 * 1024 * 1024,              # headroom; fits v7x 64 MiB
        ),
    )(V_p, batch2d, w2d, b2d)
    return out[:B]


def _reference(V, batch_idx, w, b, num_graphs):
    """Pure-JAX reference (scatter_softmax + scatter_sum)."""
    scores = V @ w.reshape(-1, 1) + b.reshape(1, 1)                     # (N, 1)
    onehot = jax.nn.one_hot(batch_idx, num_graphs, dtype=jnp.float32)   # (N, B)
    masked = jnp.where(onehot > 0, scores, -jnp.inf)
    seg_max = jnp.max(masked, axis=0, keepdims=True)
    e = jnp.where(onehot > 0, jnp.exp(masked - seg_max), 0.0)
    alpha = e / jnp.sum(e, axis=0, keepdims=True)                       # (N, B)
    return alpha.T @ V                                                  # (B, D)


if __name__ == "__main__":
    key = jax.random.PRNGKey(0)
    k_v, k_w, k_b, k_v2, k_idx2 = jax.random.split(key, 5)

    # --- Case 1: tiny, single-tile (b=2 graphs, 8 nodes each, d_v=32) ---
    num_graphs = 2
    nodes_per_graph = 8
    N = num_graphs * nodes_per_graph
    D = 32

    V = jax.random.normal(k_v, (N, D), dtype=jnp.float32)
    batch_idx = jnp.repeat(jnp.arange(num_graphs, dtype=jnp.int32), nodes_per_graph)

    bound = 1.0 / jnp.sqrt(jnp.float32(D))
    a_weight = jax.random.uniform(k_w, (1, D), minval=-bound, maxval=bound,
                                  dtype=jnp.float32)
    a_bias = jax.random.uniform(k_b, (1,), minval=-bound, maxval=bound,
                                dtype=jnp.float32)

    H = jax.block_until_ready(
        gated_aggregation(V, batch_idx, a_weight, a_bias, num_graphs))
    H_ref = _reference(V, batch_idx, a_weight, a_bias, num_graphs)
    assert H.shape == (num_graphs, D)
    assert jnp.allclose(H, H_ref, atol=1e-4, rtol=1e-4), "case 1 mismatch vs reference"

    # --- Case 2: multi-tile grid (exercises the online-softmax accumulator) ---
    num_graphs2, N2 = 3, 192   # with tile_n=128 -> 2 grid steps (incl. N padding)
    V2 = jax.random.normal(k_v2, (N2, D), dtype=jnp.float32)
    batch_idx2 = jax.random.randint(k_idx2, (N2,), 0, num_graphs2, dtype=jnp.int32)

    H2 = jax.block_until_ready(
        gated_aggregation(V2, batch_idx2, a_weight, a_bias, num_graphs2, tile_n=128))
    H2_ref = _reference(V2, batch_idx2, a_weight, a_bias, num_graphs2)
    assert H2.shape == (num_graphs2, D)
    assert jnp.allclose(H2, H2_ref, atol=1e-4, rtol=1e-4), "case 2 mismatch vs reference"

    print("KERNEL_OK")
</pallas_src>

<mosaic_0001>
module attributes {stable_mosaic.version = 11 : i64} {
  func.func @_gated_kernel(%arg0: i32, %arg1: memref<16x32xf32, #tpu.memory_space<vmem>>, %arg2: memref<1x16xi32, #tpu.memory_space<vmem>>, %arg3: memref<1x32xf32, #tpu.memory_space<vmem>>, %arg4: memref<1x1xf32, #tpu.memory_space<vmem>>, %arg5: memref<8x32xf32, #tpu.memory_space<vmem>>, %arg6: memref<8x1xf32, #tpu.memory_space<vmem>>, %arg7: memref<8x1xf32, #tpu.memory_space<vmem>>, %arg8: memref<8x32xf32, #tpu.memory_space<vmem>>) attributes {dimension_semantics = [#tpu.dimension_semantics<arbitrary>], iteration_bounds = array<i64: 1>, scalar_prefetch = 0 : i64, scratch_operands = 3 : i64, tpu.core_type = #tpu.core_type<tc>, window_params = [{transform_indices = @transform_0, window_bounds = array<i64: 16, 32>}, {transform_indices = @transform_1, window_bounds = array<i64: 1, 16>}, {pipeline_mode = #tpu.pipeline_mode<synchronous>, transform_indices = @transform_2, window_bounds = array<i64: 1, 32>}, {pipeline_mode = #tpu.pipeline_mode<synchronous>, transform_indices = @transform_3, window_bounds = array<i64: 1, 1>}, {pipeline_mode = #tpu.pipeline_mode<synchronous>, transform_indices = @transform_4, window_bounds = array<i64: 8, 32>}]} {
    %c0_i32 = arith.constant 0 : i32
    %0 = arith.cmpi eq, %arg0, %c0_i32 : i32
    %1 = arith.extui %0 : i1 to i32
    %c0_i32_0 = arith.constant 0 : i32
    %2 = arith.cmpi ne, %1, %c0_i32_0 : i32
    scf.if %2 {
      %cst_29 = arith.constant -1.000000e+30 : f32
      %45 = vector.broadcast %cst_29 : f32 to vector<8x1xf32>
      %c0_30 = arith.constant 0 : index
      %c0_31 = arith.constant 0 : index
      %46 = vector.load %arg6[%c0_30, %c0_31] : memref<8x1xf32, #tpu.memory_space<vmem>>, vector<8x1xf32>
      tpu.vector_store %arg6[%c0_30, %c0_31], %45 {strides = array<i32>} : memref<8x1xf32, #tpu.memory_space<vmem>>, vector<8x1xf32>,
      %cst_32 = arith.constant 0.000000e+00 : f32
      %47 = vector.broadcast %cst_32 : f32 to vector<8x1xf32>
      %c0_33 = arith.constant 0 : index
      %c0_34 = arith.constant 0 : index
      %48 = vector.load %arg7[%c0_33, %c0_34] : memref<8x1xf32, #tpu.memory_space<vmem>>, vector<8x1xf32>
      tpu.vector_store %arg7[%c0_33, %c0_34], %47 {strides = array<i32>} : memref<8x1xf32, #tpu.memory_space<vmem>>, vector<8x1xf32>,
      %cst_35 = arith.constant 0.000000e+00 : f32
      %49 = vector.broadcast %cst_35 : f32 to vector<8x32xf32>
      %c0_36 = arith.constant 0 : index
      %c0_37 = arith.constant 0 : index
      %50 = vector.load %arg8[%c0_36, %c0_37] : memref<8x32xf32, #tpu.memory_space<vmem>>, vector<8x32xf32>
      tpu.vector_store %arg8[%c0_36, %c0_37], %49 {strides = array<i32>} : memref<8x32xf32, #tpu.memory_space<vmem>>, vector<8x32xf32>,
    } else {
    }
    %c0 = arith.constant 0 : index
    %c0_1 = arith.constant 0 : index
    %3 = vector.load %arg1[%c0, %c0_1] : memref<16x32xf32, #tpu.memory_space<vmem>>, vector<16x32xf32>
    %c0_2 = arith.constant 0 : index
    %c0_3 = arith.constant 0 : index
    %4 = vector.load %arg2[%c0_2, %c0_3] : memref<1x16xi32, #tpu.memory_space<vmem>>, vector<1x16xi32>
    %c0_4 = arith.constant 0 : index
    %c0_5 = arith.constant 0 : index
    %5 = vector.load %arg3[%c0_4, %c0_5] : memref<1x32xf32, #tpu.memory_space<vmem>>, vector<1x32xf32>
    %cst = arith.constant dense<0.000000e+00> : vector<1x16xf32>
    %6 = tpu.matmul %5, %3, %cst {dimension_numbers = #tpu.dot_dimension_numbers<[1], [1], [0], [0], [0, 0, 1, 0], [], []>} : vector<1x32xf32>, vector<16x32xf32>, vector<1x16xf32> -> vector<1x16xf32>
    %c0_6 = arith.constant 0 : index
    %c0_7 = arith.constant 0 : index
    %7 = vector.load %arg4[%c0_6, %c0_7] : memref<1x1xf32, #tpu.memory_space<vmem>>, vector<1x1xf32>
    %8 = vector.broadcast %7 : vector<1x1xf32> to vector<1x16xf32>
    %9 = arith.addf %6, %8 : vector<1x16xf32>
    %10 = tpu.iota {dimensions = array<i32: 0>} : vector<8x16xi32>
    %11 = vector.broadcast %4 : vector<1x16xi32> to vector<8x16xi32>
    %12 = arith.cmpi eq, %11, %10 : vector<8x16xi32>
    %cst_8 = arith.constant -1.000000e+30 : f32
    %13 = vector.shape_cast %9 : vector<1x16xf32> to vector<1x16xf32>
    %14 = vector.broadcast %13 : vector<1x16xf32> to vector<8x16xf32>
    %15 = vector.broadcast %cst_8 : f32 to vector<8x16xf32>
    %16 = arith.select %12, %14, %15 : vector<8x16xi1>, vector<8x16xf32>
    %cst_9 = arith.constant dense<0xFF800000> : vector<8xf32>
    %17 = vector.multi_reduction <maximumf>, %16, %cst_9 [1] : vector<8x16xf32> to vector<8xf32>
    %18 = vector.shape_cast %17 : vector<8xf32> to vector<8x1xf32>
    %c0_10 = arith.constant 0 : index
    %c0_11 = arith.constant 0 : index
    %19 = vector.load %arg6[%c0_10, %c0_11] : memref<8x1xf32, #tpu.memory_space<vmem>>, vector<8x1xf32>
    %20 = arith.maximumf %19, %18 : vector<8x1xf32>
    %c0_12 = arith.constant 0 : index
    %c0_13 = arith.constant 0 : index
    %21 = vector.load %arg6[%c0_12, %c0_13] : memref<8x1xf32, #tpu.memory_space<vmem>>, vector<8x1xf32>
    %22 = arith.subf %21, %20 : vector<8x1xf32>
    %23 = math.exp %22 : vector<8x1xf32>
    %24 = vector.broadcast %20 : vector<8x1xf32> to vector<8x16xf32>
    %25 = arith.subf %16, %24 : vector<8x16xf32>
    %26 = math.exp %25 : vector<8x16xf32>
    %cst_14 = arith.constant 0.000000e+00 : f32
    %27 = vector.broadcast %cst_14 : f32 to vector<8x16xf32>
    %28 = arith.select %12, %26, %27 : vector<8x16xi1>, vector<8x16xf32>
    %c0_15 = arith.constant 0 : index
    %c0_16 = arith.constant 0 : index
    %29 = vector.load %arg7[%c0_15, %c0_16] : memref<8x1xf32, #tpu.memory_space<vmem>>, vector<8x1xf32>
    %30 = arith.mulf %23, %29 : vector<8x1xf32>
    %cst_17 = arith.constant dense<0.000000e+00> : vector<8xf32>
    %31 = vector.multi_reduction <add>, %28, %cst_17 [1] : vector<8x16xf32> to vector<8xf32>
    %32 = vector.shape_cast %31 : vector<8xf32> to vector<8x1xf32>
    %33 = arith.addf %30, %32 : vector<8x1xf32>
    %c0_18 = arith.constant 0 : index
    %c0_19 = arith.constant 0 : index
    %34 = vector.load %arg7[%c0_18, %c0_19] : memref<8x1xf32, #tpu.memory_space<vmem>>, vector<8x1xf32>
    tpu.vector_store %arg7[%c0_18, %c0_19], %33 {strides = array<i32>} : memref<8x1xf32, #tpu.memory_space<vmem>>, vector<8x1xf32>,
    %c0_20 = arith.constant 0 : index
    %c0_21 = arith.constant 0 : index
    %35 = vector.load %arg8[%c0_20, %c0_21] : memref<8x32xf32, #tpu.memory_space<vmem>>, vector<8x32xf32>
    %36 = vector.broadcast %23 : vector<8x1xf32> to vector<8x32xf32>
    %37 = arith.mulf %36, %35 : vector<8x32xf32>
    %cst_22 = arith.constant dense<0.000000e+00> : vector<8x32xf32>
    %38 = tpu.matmul %28, %3, %cst_22 {dimension_numbers = #tpu.dot_dimension_numbers<[1], [0], [0], [1], [0, 0, 1, 1], [], []>} : vector<8x16xf32>, vector<16x32xf32>, vector<8x32xf32> -> vector<8x32xf32>
    %39 = arith.addf %37, %38 : vector<8x32xf32>
    %c0_23 = arith.constant 0 : index
    %c0_24 = arith.constant 0 : index
    %40 = vector.load %arg8[%c0_23, %c0_24] : memref<8x32xf32, #tpu.memory_space<vmem>>, vector<8x32xf32>
    tpu.vector_store %arg8[%c0_23, %c0_24], %39 {strides = array<i32>} : memref<8x32xf32, #tpu.memory_space<vmem>>, vector<8x32xf32>,
    %c0_25 = arith.constant 0 : index
    %c0_26 = arith.constant 0 : index
    %41 = vector.load %arg6[%c0_25, %c0_26] : memref<8x1xf32, #tpu.memory_space<vmem>>, vector<8x1xf32>
    tpu.vector_store %arg6[%c0_25, %c0_26], %20 {strides = array<i32>} : memref<8x1xf32, #tpu.memory_space<vmem>>, vector<8x1xf32>,
    %c0_i32_27 = arith.constant 0 : i32
    %42 = arith.cmpi eq, %arg0, %c0_i32_27 : i32
    %43 = arith.extui %42 : i1 to i32
    %c0_i32_28 = arith.constant 0 : i32
    %44 = arith.cmpi ne, %43, %c0_i32_28 : i32
    scf.if %44 {
      %c0_29 = arith.constant 0 : index
      %c0_30 = arith.constant 0 : index
      %45 = vector.load %arg7[%c0_29, %c0_30] : memref<8x1xf32, #tpu.memory_space<vmem>>, vector<8x1xf32>
      %cst_31 = arith.constant 1.000000e-30 : f32
      %46 = vector.broadcast %cst_31 : f32 to vector<8x1xf32>
      %47 = arith.maximumf %45, %46 : vector<8x1xf32>
      %48 = tpu.reciprocal %47 : vector<8x1xf32> -> vector<8x1xf32>
      %c0_32 = arith.constant 0 : index
      %c0_33 = arith.constant 0 : index
      %49 = vector.load %arg8[%c0_32, %c0_33] : memref<8x32xf32, #tpu.memory_space<vmem>>, vector<8x32xf32>
      %50 = vector.broadcast %48 : vector<8x1xf32> to vector<8x32xf32>
      %51 = arith.mulf %49, %50 : vector<8x32xf32>
      %c0_34 = arith.constant 0 : index
      %c0_35 = arith.constant 0 : index
      %52 = vector.load %arg5[%c0_34, %c0_35] : memref<8x32xf32, #tpu.memory_space<vmem>>, vector<8x32xf32>
      tpu.vector_store %arg5[%c0_34, %c0_35], %51 {strides = array<i32>} : memref<8x32xf32, #tpu.memory_space<vmem>>, vector<8x32xf32>,
    } else {
    }
    return
  }
  func.func @transform_0(%arg0: i32) -> (i32, i32) {
    %c0_i32 = arith.constant 0 : i32
    %c0_i32_0 = arith.constant 0 : i32
    return %arg0, %c0_i32 : i32, i32
  }
  func.func @transform_1(%arg0: i32) -> (i32, i32) {
    %c0_i32 = arith.constant 0 : i32
    %c0_i32_0 = arith.constant 0 : i32
    return %c0_i32, %arg0 : i32, i32
  }
  func.func @transform_2(%arg0: i32) -> (i32, i32) {
    %c0_i32 = arith.constant 0 : i32
    %c0_i32_0 = arith.constant 0 : i32
    %c0_i32_1 = arith.constant 0 : i32
    return %c0_i32, %c0_i32_0 : i32, i32
  }
  func.func @transform_3(%arg0: i32) -> (i32, i32) {
    %c0_i32 = arith.constant 0 : i32
    %c0_i32_0 = arith.constant 0 : i32
    %c0_i32_1 = arith.constant 0 : i32
    return %c0_i32, %c0_i32_0 : i32, i32
  }
  func.func @transform_4(%arg0: i32) -> (i32, i32) {
    %c0_i32 = arith.constant 0 : i32
    %c0_i32_0 = arith.constant 0 : i32
    %c0_i32_1 = arith.constant 0 : i32
    return %c0_i32, %c0_i32_0 : i32, i32
  }
}

</mosaic_0001>

<bundles_post_ra>
// kernel: tpu_custom_call.1
= control target key start
LH: loop header
LB: loop body
LE: loop exit
PB: predicated region body
PF: predicated region fallthrough
CT: control target
= control target key end

     0   :  { %s435_s0 = inlined_call_operand.hbm [shape: f32[16,32], index: 0, kind: input, shape index: {}]   ;;  %s436_s1 = inlined_call_operand.vmem [shape: s32[1,16], index: 1, kind: input, shape index: {}]   ;;  %s437_s2 = inlined_call_operand.vmem [shape: f32[1,32], index: 2, kind: input, shape index: {}]   ;;  %s438_s3 = inlined_call_operand.<no memory space> [shape: f32[1,1], index: 3, kind: input, shape index: {}]   ;;  %s439_s4 = inlined_call_operand.hbm [shape: f32[8,32], index: 4, kind: output, shape index: {}]  }
   0x1   :  { %v9_v0 = vstv %s438_s3 }
   0x2   :  { %10 = vst [vmem:[#allocation5] sm:$0x1] %v9_v0 }
   0x3   :  { %11 = vsyncpa [#allocation7], 0 }
   0x4   :  { %12 = vsyncpa [#allocation8], 0  ;;  %s372_s17 = smov [#allocation6]  }
   0x5   :  { %s18_s18 = sshll.u32 %s372_s17, 4  ;;  %s19_s18 = int_to_ptr.vmem [resolvable:$true] %s18_s18 }
   0x6   :  { %s336_s19 = scalar_lea.vmem %s19_s18, 256  ;;  %p341_p1 = scmp.lt.s32.totalorder %s19_s18, %s19_s18 }
   0x7   :  { %p337_p0 = scmp.ne.s32.totalorder %s19_s18, %s336_s19  ;;  %p342_p2 = scmp.lt.s32.totalorder %s336_s19, %s336_s19 }
   0x9   :  { %p343_p3 = por %p342_p2, %p341_p1 }
   0xb   :  { %p344_p4 = pnand %p343_p3, %p337_p0 }
   0xd   :  { %347 = shalt.err (!%p344_p4)
}
   0xe   :  { %s373_s20 = smov 128   ;;  %s374_s21 = smov 8  }
   0xf   :  { %24 = dma.hbm_to_vmem [thread:$0]  %s435_s0, 256, %s19_s18, [#allocation7], %s373_s20, %s373_s20, %s374_s21  }
  0x10   :  { %368 = dma.done.wait [#allocation7], 256  }
  0x11   :  { %369 = vsyncadd [#allocation7], 4294967040  ;;  %vm41_vm0 = vcmask 261120   ;;  %v375_v1 = vmov 0.0   ;;  %vm376_vm1 = vmmov 0   ;;  %v377_v2 = vmov 0  }
  0x12   :  { %298 = vmatprep.subr.mxu0 %v375_v1  ;;  %42 = vst.msk [vmem:[#allocation4] sm:$0xff] %vm41_vm0, %v375_v1  ;;  %302 = vmatprep.mubr.msk.f32.mxu0 %vm376_vm1, %v375_v1  ;;  %v44_v3 = vld [vmem:[#allocation6 + $0x8] sm:$0xff]  ;;  %v47_v4 = vld [vmem:[#allocation5] sm:$0x1]  ;;  %v43_v5 = vld [vmem:[#allocation6] sm:$0xff]  ;;  %vm38_vm2 = vcmask 7168   ;;  %v53_v8 = vlaneseq }
  0x13   :  { %320 = vset.pattern.permute.xlu0 %v377_v2  ;;  %321 = vset.pattern.permute.xlu1 %v377_v2  ;;  %v46_v6 = vld [vmem:[%s437_s2] sm:$0x1]  ;;  %v378_v7 = vmov -1e+30   ;;  %40 = vst.msk [vmem:[#allocation3] sm:$0xff] %vm38_vm2, %v375_v1  ;;  %vm149_vm4 = vcmask 130048  }
  0x14   :  { %305 = vmatprep.subr.mxu1 %v375_v1  ;;  %309 = vmatprep.mubr.msk.f32.mxu1 %vm376_vm1, %v375_v1  ;;  %39 = vst.msk [vmem:[#allocation2] sm:$0xff] %vm38_vm2, %v378_v7  ;;  %v54_v9 = vshrl.u32 %v53_v8, 7  ;;  %v290_v13 = vld [vmem:[%s436_s1] ss:$0 sm:$0xff]  ;;  %s379_s1 = smov [#allocation9]  }
  0x15   :  { %299 = vmatpush3.xpose.msk.msra.mxu0 %vm41_vm0, %v44_v3  ;;  %306 = vmatpush3.msra.mxu1 %v44_v3  ;;  %s278_s2 = sshll.u32 %s379_s1, 4  ;;  %s279_s2 = int_to_ptr.vmem [resolvable:$true] %s278_s2 }
  0x16   :  { %300 = vmatprep.subr.mxu0 %v375_v1  ;;  %50 = vperm.xlu0 %320, %v47_v4   ;;  %v55_v10 = vsub.s32 0, %v54_v9  ;;  %vm143_vm3 = vcmp.eq.s32.totalorder %v290_v13, %v54_v9  ;;  %s348_s26 = scalar_lea.vmem %s279_s2, 128  ;;  %p353_p6 = scmp.lt.s32.totalorder %s279_s2, %s279_s2 }
  0x17   :  { %307 = vmatprep.subr.mxu1 %v375_v1  ;;  %p349_p5 = scmp.ne.s32.totalorder %s279_s2, %s348_s26  ;;  %p354_p7 = scmp.lt.s32.totalorder %s348_s26, %s348_s26 }
  0x18   :  { %308 = vmatpush3.msra.mxu1 %v43_v5 }
  0x19   :  { %301 = vmatpush3.xpose.msk.msra.mxu0 %vm41_vm0, %v43_v5  ;;  %v175_v39 = vld [vmem:[#allocation4] sm:$0xff]  ;;  %p355_p8 = por %p354_p7, %p353_p6 }
  0x1a   :  { %v167_v32 = vld [vmem:[#allocation3] sm:$0xff] }
  0x1b   :  { %v153_v20 = vld [vmem:[#allocation2] sm:$0xff]  ;;  %p356_p9 = pnand %p355_p8, %p349_p5 }
  0x1c   :  { %303 = vmatmul.mubr.msk.f32.vlgmr.msra.gmra.mxu0 %vm41_vm0, %v46_v6 }
  0x91   :  { %v51_v11 = vpop.permute.xlu0 %50 }
  0x92   :  { %v56_v12 = vrot.slane %v51_v11, %v55_v10 }
  0xdc   :  { %v133_v14 = vpop.f32.mrf.mxu0 }
  0xdd   :  { %v134_v15 = vadd.f32 %v133_v14, %v56_v12 }
  0xde   :  { %v304_v16 = vpop.f32.mrf.mxu0 }
  0xdf   :  { %v147_v17 = vrot.slane %v134_v15, %v55_v10 }
  0xe1   :  { %v148_v18 = vsel %vm143_vm3, %v147_v17, -1e+30 }
  0xe2   :  { %v150_v19 = vsel %vm149_vm4, %v148_v18, -inf }
  0xe3   :  { %151 = vmax.xlane.f32.xlu0 %v150_v19 }
 0x16c   :  { %v152_v21 = vpop.xlane.xlu0 %151 }
 0x16d   :  { %v154_v22 = vmax.f32 %v153_v20, %v152_v21 }
 0x16f   :  { %v155_v23 = vsub.f32 %v153_v20, %v154_v22  ;;  %257 = vst.msk [vmem:[#allocation2] sm:$0xff] %vm38_vm2, %v154_v22  ;;  %160 = vperm.xlu1 %321, %v154_v22  }
 0x171   :  { %v156_v24 = vmul.f32 1.442695, %v155_v23 }
 0x173   :  { %322 = vpow2.f32 %v156_v24 }
 0x180   :  { %v323_v25 = vpop.eup %322 }
 0x181   :  { %178 = vperm.xlu0 %320, %v323_v25   ;;  %v168_v33 = vmul.f32 %v323_v25, %v167_v32 }
 0x1ea   :  { %v161_v26 = vpop.permute.xlu1 %160 }
 0x1eb   :  { %v163_v27 = vsub.f32 %v148_v18, %v161_v26 }
 0x1ed   :  { %v164_v28 = vmul.f32 1.442695, %v163_v27 }
 0x1ef   :  { %324 = vpow2.f32 %v164_v28 }
 0x1fc   :  { %v325_v29 = vpop.eup %324  ;;  %v179_v40 = vpop.permute.xlu0 %178 }
 0x1fd   :  { %v166_v30 = vsel %vm143_vm3, %v325_v29, 0.0  ;;  %v181_v41 = vmul.f32 %v179_v40, %v175_v39 }
 0x1fe   :  { %310 = vmatmul.mubr.msk.f32.vlgmr.msra.gmra.mxu1 %vm149_vm4, %v166_v30  ;;  %v169_v31 = vsel %vm149_vm4, %v166_v30, 0.0 }
 0x1ff   :  { %170 = vadd.xlane.f32.xlu1 %v169_v31 }
 0x288   :  { %v171_v34 = vpop.xlane.xlu1 %170 }
 0x289   :  { %v172_v35 = vadd.f32 %v171_v34, %v168_v33 }
 0x28b   :  { %174 = vst.msk [vmem:[#allocation3] sm:$0xff] %vm38_vm2, %v172_v35 }
 0x292   :  { %v261_v36 = vld [vmem:[#allocation3] sm:$0xff] }
 0x293   :  { %v262_v37 = vmax.f32 %v261_v36, 1e-30 }
 0x295   :  { %326 = vrcp.f32 %v262_v37 }
 0x2a2   :  { %v327_v38 = vpop.eup %326 }
 0x2a3   :  { %267 = vperm.xlu1 %321, %v327_v38  }
 0x2be   :  { %v251_v42 = vpop.f32.mrf.mxu1 }
 0x2bf   :  { %v255_v43 = vadd.f32 %v251_v42, %v181_v41 }
 0x2c0   :  { %v311_v44 = vpop.f32.mrf.mxu1 }
 0x2c1   :  { %256 = vst.msk [vmem:[#allocation4] sm:$0xff] %vm41_vm0, %v255_v43 }
 0x2c8   :  { %v264_v45 = vld [vmem:[#allocation4] sm:$0xff] }
 0x31e   :  { %v268_v46 = vpop.permute.xlu1 %267 }
 0x31f   :  { %v270_v47 = vmul.f32 %v268_v46, %v264_v45 }
 0x321   :  { %271 = vst.msk [vmem:[#allocation9] sm:$0xff] %vm41_vm0, %v270_v47 }
 0x322   :  { %359 = shalt.err (!%p356_p9)
}
 0x323   :  { %281 = dma.vmem_to_hbm [thread:$0]  %s279_s2, 128, %s439_s4, [#allocation8]  }
 0x324   :  { %370 = dma.done.wait [#allocation8], 128  }
 0x325   :  { %371 = vsyncadd [#allocation8], 4294967168 }
 0x326   :  { %285 = vsyncpa [#allocation7], 1 }
 0x327   :  { %286 = vsyncpa [#allocation8], 1 }

</bundles_post_ra>
